<compile_context>
chip_gen: v5e
topology: v5e:2x2
jax: 0.10.0
libtpu: 0.0.40
codegen_flags: <defaults>
</compile_context>

<pallas_src>
import jax
import jax.numpy as jnp
from jax import lax
from jax.experimental import pallas as pl
from jax.experimental.pallas import tpu as pltpu


def classifier_kernel(x_ref, w_ref, b_ref, o_ref):
    """Single-block linear head: o = x @ w^T + b.

    x_ref: (B, K)   features, K on the lane axis
    w_ref: (Np, K)  weight in native torch Linear layout (lane-dense K)
    b_ref: (1, Np)  bias
    o_ref: (B, Np)  logits
    """
    acc = lax.dot_general(
        x_ref[...],
        w_ref[...],
        dimension_numbers=(((1,), (1,)), ((), ())),   # contract K with K (NT)
        preferred_element_type=jnp.float32,
    )
    o_ref[...] = (acc + b_ref[...]).astype(o_ref.dtype)


def autoeye_classifier(feats_2d, weight_nk, bias_2d):
    """feats_2d: (B, K) f32, weight_nk: (Np, K) f32, bias_2d: (1, Np) f32 -> (B, Np) f32."""
    B, K = feats_2d.shape
    Np, Kw = weight_nk.shape
    assert K == Kw
    return pl.pallas_call(
        classifier_kernel,
        out_shape=jax.ShapeDtypeStruct((B, Np), feats_2d.dtype),
        grid_spec=pltpu.PrefetchScalarGridSpec(
            num_scalar_prefetch=0,
            grid=(1,),  # everything fits VMEM comfortably; one block, no pipelining
            in_specs=[
                pl.BlockSpec((B, K), lambda i: (0, 0)),    # feats, full K resident
                pl.BlockSpec((Np, K), lambda i: (0, 0)),   # weight, lane-dense native layout
                pl.BlockSpec((1, Np), lambda i: (0, 0)),   # bias
            ],
            out_specs=pl.BlockSpec((B, Np), lambda i: (0, 0)),
        ),
    )(feats_2d, weight_nk, bias_2d)


def autoeye_forward(feats_nchw, weight, bias):
    """AutoEye.forward for the 'resnet' branch, starting from backbone features.

    feats_nchw: (B, 2048, 1, 1) float32  (NCHW, as produced by the torch backbone)
    weight:     (5, 2048) float32  (torch nn.Linear(2048, 5).weight layout)
    bias:       (5,) float32
    returns:    (B, 5) float32 logits
    """
    B = feats_nchw.shape[0]
    K = weight.shape[1]
    N = weight.shape[0]

    feats_2d = feats_nchw.reshape(B, K)             # x.reshape(-1, 2048)

    # Pad the 5 output rows to a sublane multiple (one-time, would be done at
    # weight-load time in production); slice the logits back outside the kernel.
    Np = 8
    w_pad = jnp.zeros((Np, K), weight.dtype).at[:N, :].set(weight)
    b_pad = jnp.zeros((1, Np), bias.dtype).at[0, :N].set(bias)

    out = autoeye_classifier(feats_2d, w_pad, b_pad)
    return out[:, :N]


if __name__ == "__main__":
    key = jax.random.PRNGKey(0)
    k_feat, k_w, k_b = jax.random.split(key, 3)

    B, C = 8, 2048  # small batch; channel dim fixed by the module (Linear(2048, 5))

    # Synthetic backbone features (what resnext50_32x4d-minus-fc would emit), NCHW.
    feats = jax.random.normal(k_feat, (B, C, 1, 1), dtype=jnp.float32)

    # Deterministic nn.Linear(2048, 5)-shaped parameters (uniform +-1/sqrt(in_features)).
    bound = 1.0 / (C ** 0.5)
    weight = jax.random.uniform(k_w, (5, C), minval=-bound, maxval=bound, dtype=jnp.float32)
    bias = jax.random.uniform(k_b, (5,), minval=-bound, maxval=bound, dtype=jnp.float32)

    out = autoeye_forward(feats, weight, bias)
    out = jax.block_until_ready(out)

    # Cross-check against plain-JAX reference.
    ref = feats.reshape(B, C) @ weight.T + bias
    assert out.shape == (B, 5)
    assert jnp.allclose(out, ref, atol=1e-4, rtol=1e-4)

    print("KERNEL_OK")
</pallas_src>

<mosaic_0001>
module attributes {stable_mosaic.version = 11 : i64} {
  func.func @classifier_kernel(%arg0: i32, %arg1: memref<8x2048xf32, #tpu.memory_space<vmem>>, %arg2: memref<8x2048xf32, #tpu.memory_space<vmem>>, %arg3: memref<1x8xf32, #tpu.memory_space<vmem>>, %arg4: memref<8x8xf32, #tpu.memory_space<vmem>>) attributes {dimension_semantics = [#tpu.dimension_semantics<arbitrary>], iteration_bounds = array<i64: 1>, scalar_prefetch = 0 : i64, scratch_operands = 0 : i64, tpu.core_type = #tpu.core_type<tc>, window_params = [{pipeline_mode = #tpu.pipeline_mode<synchronous>, transform_indices = @transform_0, window_bounds = array<i64: 8, 2048>}, {pipeline_mode = #tpu.pipeline_mode<synchronous>, transform_indices = @transform_1, window_bounds = array<i64: 8, 2048>}, {pipeline_mode = #tpu.pipeline_mode<synchronous>, transform_indices = @transform_2, window_bounds = array<i64: 1, 8>}, {pipeline_mode = #tpu.pipeline_mode<synchronous>, transform_indices = @transform_3, window_bounds = array<i64: 8, 8>}]} {
    %c0 = arith.constant 0 : index
    %c0_0 = arith.constant 0 : index
    %0 = vector.load %arg1[%c0, %c0_0] : memref<8x2048xf32, #tpu.memory_space<vmem>>, vector<8x2048xf32>
    %c0_1 = arith.constant 0 : index
    %c0_2 = arith.constant 0 : index
    %1 = vector.load %arg2[%c0_1, %c0_2] : memref<8x2048xf32, #tpu.memory_space<vmem>>, vector<8x2048xf32>
    %cst = arith.constant dense<0.000000e+00> : vector<8x8xf32>
    %2 = tpu.matmul %0, %1, %cst {dimension_numbers = #tpu.dot_dimension_numbers<[1], [1], [0], [0], [0, 0, 1, 0], [], []>} : vector<8x2048xf32>, vector<8x2048xf32>, vector<8x8xf32> -> vector<8x8xf32>
    %c0_3 = arith.constant 0 : index
    %c0_4 = arith.constant 0 : index
    %3 = vector.load %arg3[%c0_3, %c0_4] : memref<1x8xf32, #tpu.memory_space<vmem>>, vector<1x8xf32>
    %4 = vector.broadcast %3 : vector<1x8xf32> to vector<8x8xf32>
    %5 = arith.addf %2, %4 : vector<8x8xf32>
    %c0_5 = arith.constant 0 : index
    %c0_6 = arith.constant 0 : index
    %6 = vector.load %arg4[%c0_5, %c0_6] : memref<8x8xf32, #tpu.memory_space<vmem>>, vector<8x8xf32>
    tpu.vector_store %arg4[%c0_5, %c0_6], %5 {strides = array<i32>} : memref<8x8xf32, #tpu.memory_space<vmem>>, vector<8x8xf32>,
    return
  }
  func.func @transform_0(%arg0: i32) -> (i32, i32) {
    %c0_i32 = arith.constant 0 : i32
    %c0_i32_0 = arith.constant 0 : i32
    %c0_i32_1 = arith.constant 0 : i32
    return %c0_i32, %c0_i32_0 : i32, i32
  }
  func.func @transform_1(%arg0: i32) -> (i32, i32) {
    %c0_i32 = arith.constant 0 : i32
    %c0_i32_0 = arith.constant 0 : i32
    %c0_i32_1 = arith.constant 0 : i32
    return %c0_i32, %c0_i32_0 : i32, i32
  }
  func.func @transform_2(%arg0: i32) -> (i32, i32) {
    %c0_i32 = arith.constant 0 : i32
    %c0_i32_0 = arith.constant 0 : i32
    %c0_i32_1 = arith.constant 0 : i32
    return %c0_i32, %c0_i32_0 : i32, i32
  }
  func.func @transform_3(%arg0: i32) -> (i32, i32) {
    %c0_i32 = arith.constant 0 : i32
    %c0_i32_0 = arith.constant 0 : i32
    %c0_i32_1 = arith.constant 0 : i32
    return %c0_i32, %c0_i32_0 : i32, i32
  }
}

</mosaic_0001>

<bundles_post_ra>
// kernel: tpu_custom_call.1
= control target key start
LH: loop header
LB: loop body
LE: loop exit
PB: predicated region body
PF: predicated region fallthrough
CT: control target
= control target key end

     0   :  { %8 = vsyncpa [#allocation3], 0  ;;  %s536_s0 = inlined_call_operand.hbm [shape: f32[8,2048], index: 0, kind: input, shape index: {}]   ;;  %s537_s1 = inlined_call_operand.hbm [shape: f32[8,2048], index: 1, kind: input, shape index: {}]   ;;  %s538_s2 = inlined_call_operand.vmem [shape: f32[1,8], index: 2, kind: input, shape index: {}]   ;;  %s539_s3 = inlined_call_operand.hbm [shape: f32[8,8], index: 3, kind: output, shape index: {}]  }
   0x1   :  { %9 = vsyncpa [#allocation6], 0 }
   0x2   :  { %10 = vsyncpa [#allocation4], 0  ;;  %s16_s14 = sshll.u32 %s536_s0, 4  ;;  %s501_s15 = smov [#allocation2]   ;;  %s17_s14 = int_to_ptr.hbm [resolvable:$true] %s16_s14 }
   0x3   :  { %s18_s16 = sshll.u32 %s501_s15, 4  ;;  %s27_s19 = sshll.u32 %s537_s1, 4  ;;  %s19_s16 = int_to_ptr.vmem [resolvable:$true] %s18_s16  ;;  %s28_s19 = int_to_ptr.hbm [resolvable:$true] %s27_s19 }
   0x4   :  { %21 = dma.hbm_to_vmem [thread:$0]  %s17_s14, 2048, %s19_s16, [#allocation3]  }
   0x5   :  { %s502_s20 = smov [#allocation5]  }
   0x6   :  { %s29_s21 = sshll.u32 %s502_s20, 4  ;;  %s30_s21 = int_to_ptr.vmem [resolvable:$true] %s29_s21 }
   0x7   :  { %32 = dma.hbm_to_vmem [thread:$0]  %s28_s19, 2048, %s30_s21, [#allocation6]  }
   0x8   :  { %495 = dma.done.wait [#allocation3], 2048  }
   0x9   :  { %496 = vsyncadd [#allocation3], 4294965248 }
   0xa   :  { %497 = dma.done.wait [#allocation6], 2048  }
   0xb   :  { %498 = vsyncadd [#allocation6], 4294965248  ;;  %v61_v0 = vld [vmem:[#allocation5 + $0x10] sm:$0xff]  ;;  %v59_v1 = vld [vmem:[#allocation5] sm:$0xff]  ;;  %s408_s25 = sshll.u32 %s539_s3, 4  ;;  %vm399_vm0 = vcmask 64512   ;;  %s409_s25 = int_to_ptr.hbm [resolvable:$true] %s408_s25 }
   0xc   :  { %v62_v2 = vld [vmem:[#allocation5 + $0x18] sm:$0xff]  ;;  %134 = vmatpush.xpose.msra.mxu2 %v61_v0  ;;  %94 = vmatpush.xpose.msra.mxu0 %v59_v1  ;;  %v45_v3 = vld [vmem:[#allocation2 + $0x10] sm:$0xff]  ;;  %v60_v5 = vld [vmem:[#allocation5 + $0x8] sm:$0xff] }
   0xd   :  { %v65_v4 = vld [vmem:[#allocation5 + $0x30] sm:$0xff]  ;;  %154 = vmatpush.xpose.msra.mxu3 %v62_v2  ;;  %v43_v6 = vld [vmem:[#allocation2] sm:$0xff]  ;;  %v46_v7 = vld [vmem:[#allocation2 + $0x18] sm:$0xff]  ;;  %114 = vmatpush.xpose.msra.mxu1 %v60_v5 }
   0xe   :  { %v63_v8 = vld [vmem:[#allocation5 + $0x20] sm:$0xff]  ;;  %v66_v9 = vld [vmem:[#allocation5 + $0x38] sm:$0xff]  ;;  %v44_v10 = vld [vmem:[#allocation2 + $0x8] sm:$0xff] }
   0xf   :  { %v64_v11 = vld [vmem:[#allocation5 + $0x28] sm:$0xff]  ;;  %135 = vmatmul.f32.vlgmr.msra.gmra.mxu2 %v45_v3  ;;  %95 = vmatmul.f32.vlgmr.msra.gmra.mxu0 %v43_v6  ;;  %v69_v12 = vld [vmem:[#allocation5 + $0x50] sm:$0xff]  ;;  %v67_v13 = vld [vmem:[#allocation5 + $0x40] sm:$0xff] }
  0x10   :  { %214 = vmatpush.xpose.msrb.mxu2 %v65_v4  ;;  %174 = vmatpush.xpose.msrb.mxu0 %v63_v8  ;;  %v70_v14 = vld [vmem:[#allocation5 + $0x58] sm:$0xff]  ;;  %v68_v15 = vld [vmem:[#allocation5 + $0x48] sm:$0xff]  ;;  %v49_v16 = vld [vmem:[#allocation2 + $0x30] sm:$0xff] }
  0x11   :  { %155 = vmatmul.f32.vlgmr.msra.gmra.mxu3 %v46_v7  ;;  %194 = vmatpush.xpose.msrb.mxu1 %v64_v11  ;;  %v47_v17 = vld [vmem:[#allocation2 + $0x20] sm:$0xff]  ;;  %v50_v18 = vld [vmem:[#allocation2 + $0x38] sm:$0xff]  ;;  %v73_v19 = vld [vmem:[#allocation5 + $0x70] sm:$0xff] }
  0x12   :  { %234 = vmatpush.xpose.msrb.mxu3 %v66_v9  ;;  %115 = vmatmul.f32.vlgmr.msra.gmra.mxu1 %v44_v10  ;;  %v48_v20 = vld [vmem:[#allocation2 + $0x28] sm:$0xff]  ;;  %v71_v21 = vld [vmem:[#allocation5 + $0x60] sm:$0xff]  ;;  %v74_v22 = vld [vmem:[#allocation5 + $0x78] sm:$0xff] }
  0x13   :  { %v72_v23 = vld [vmem:[#allocation5 + $0x68] sm:$0xff]  ;;  %v53_v24 = vld [vmem:[#allocation2 + $0x50] sm:$0xff]  ;;  %v51_v25 = vld [vmem:[#allocation2 + $0x40] sm:$0xff] }
  0x14   :  { %294 = vmatpush.xpose.msra.mxu2 %v69_v12  ;;  %254 = vmatpush.xpose.msra.mxu0 %v67_v13  ;;  %v54_v26 = vld [vmem:[#allocation2 + $0x58] sm:$0xff]  ;;  %v52_v27 = vld [vmem:[#allocation2 + $0x48] sm:$0xff]  ;;  %v57_v28 = vld [vmem:[#allocation2 + $0x70] sm:$0xff] }
  0x15   :  { %274 = vmatpush.xpose.msra.mxu1 %v68_v15  ;;  %v55_v29 = vld [vmem:[#allocation2 + $0x60] sm:$0xff]  ;;  %v58_v30 = vld [vmem:[#allocation2 + $0x78] sm:$0xff]  ;;  %v56_v31 = vld [vmem:[#allocation2 + $0x68] sm:$0xff] }
  0x16   :  { %314 = vmatpush.xpose.msra.mxu3 %v70_v14  ;;  %v422_v32 = vld [vmem:[%s538_s2] ss:$0 sm:$0xff]  ;;  %s503_s2 = smov [#allocation7]  }
  0x17   :  { %215 = vmatmul.f32.vlgmr.msrb.gmra.mxu2 %v49_v16  ;;  %175 = vmatmul.f32.vlgmr.msrb.gmra.mxu0 %v47_v17  ;;  %s406_s22 = sshll.u32 %s503_s2, 4  ;;  %s407_s22 = int_to_ptr.vmem [resolvable:$true] %s406_s22 }
  0x18   :  { %374 = vmatpush.xpose.msrb.mxu2 %v73_v19  ;;  %334 = vmatpush.xpose.msrb.mxu0 %v71_v21 }
  0x19   :  { %235 = vmatmul.f32.vlgmr.msrb.gmra.mxu3 %v50_v18 }
  0x1a   :  { %195 = vmatmul.f32.vlgmr.msrb.gmra.mxu1 %v48_v20  ;;  %394 = vmatpush.xpose.msrb.mxu3 %v74_v22 }
  0x1b   :  { %354 = vmatpush.xpose.msrb.mxu1 %v72_v23 }
  0x1f   :  { %295 = vmatmul.f32.vlgmr.msra.gmra.mxu2 %v53_v24  ;;  %255 = vmatmul.f32.vlgmr.msra.gmra.mxu0 %v51_v25 }
  0x21   :  { %315 = vmatmul.f32.vlgmr.msra.gmra.mxu3 %v54_v26 }
  0x22   :  { %275 = vmatmul.f32.vlgmr.msra.gmra.mxu1 %v52_v27 }
  0x27   :  { %375 = vmatmul.f32.vlgmr.msrb.gmra.mxu2 %v57_v28  ;;  %335 = vmatmul.f32.vlgmr.msrb.gmra.mxu0 %v55_v29 }
  0x29   :  { %395 = vmatmul.f32.vlgmr.msrb.gmra.mxu3 %v58_v30 }
  0x2a   :  { %355 = vmatmul.f32.vlgmr.msrb.gmra.mxu1 %v56_v31 }
  0x8c   :  { %v96_v33 = vpop.f32.mrf.mxu0 }
  0x8d   :  { %v97_v34 = vadd.f32 %v422_v32, %v96_v33 }
  0x8f   :  { %v116_v35 = vpop.f32.mrf.mxu1 }
  0x90   :  { %v117_v36 = vadd.f32 %v116_v35, %v97_v34 }
  0x92   :  { %v136_v37 = vpop.f32.mrf.mxu2 }
  0x93   :  { %v137_v38 = vadd.f32 %v136_v37, %v117_v36 }
  0x94   :  { %v156_v39 = vpop.f32.mrf.mxu3  ;;  %v176_v40 = vpop.f32.mrf.mxu0 }
  0x95   :  { %v157_v41 = vadd.f32 %v156_v39, %v137_v38 }
  0x97   :  { %v196_v42 = vpop.f32.mrf.mxu1  ;;  %v177_v43 = vadd.f32 %v176_v40, %v157_v41 }
  0x99   :  { %v197_v44 = vadd.f32 %v196_v42, %v177_v43 }
  0x9a   :  { %v216_v45 = vpop.f32.mrf.mxu2 }
  0x9b   :  { %v217_v46 = vadd.f32 %v216_v45, %v197_v44 }
  0x9c   :  { %v236_v47 = vpop.f32.mrf.mxu3  ;;  %v256_v48 = vpop.f32.mrf.mxu0 }
  0x9d   :  { %v237_v49 = vadd.f32 %v236_v47, %v217_v46 }
  0x9f   :  { %v276_v50 = vpop.f32.mrf.mxu1  ;;  %v257_v51 = vadd.f32 %v256_v48, %v237_v49 }
  0xa1   :  { %v277_v52 = vadd.f32 %v276_v50, %v257_v51 }
  0xa2   :  { %v296_v53 = vpop.f32.mrf.mxu2 }
  0xa3   :  { %v297_v54 = vadd.f32 %v296_v53, %v277_v52 }
  0xa4   :  { %v316_v55 = vpop.f32.mrf.mxu3  ;;  %v336_v56 = vpop.f32.mrf.mxu0 }
  0xa5   :  { %v317_v57 = vadd.f32 %v316_v55, %v297_v54 }
  0xa7   :  { %v356_v58 = vpop.f32.mrf.mxu1  ;;  %v337_v59 = vadd.f32 %v336_v56, %v317_v57 }
  0xa9   :  { %v357_v60 = vadd.f32 %v356_v58, %v337_v59 }
  0xaa   :  { %v376_v61 = vpop.f32.mrf.mxu2 }
  0xab   :  { %v377_v62 = vadd.f32 %v376_v61, %v357_v60 }
  0xac   :  { %v396_v63 = vpop.f32.mrf.mxu3 }
  0xad   :  { %v397_v0 = vadd.f32 %v396_v63, %v377_v62 }
  0xaf   :  { %400 = vst.msk [vmem:[#allocation7] sm:$0xff] %vm399_vm0, %v397_v0 }
  0xb0   :  { %411 = dma.vmem_to_hbm [thread:$0]  %s407_s22, 128, %s409_s25, [#allocation4]  }
  0xb1   :  { %499 = dma.done.wait [#allocation4], 128  }
  0xb2   :  { %500 = vsyncadd [#allocation4], 4294967168 }
  0xb3   :  { %416 = vsyncpa [#allocation3], 1 }
  0xb4   :  { %417 = vsyncpa [#allocation6], 1 }
  0xb5   :  { %418 = vsyncpa [#allocation4], 1 }

</bundles_post_ra>
